<compile_context>
chip_gen: v7x
topology: tpu7x:2x2x1
jax: 0.10.0
libtpu: 0.0.40
codegen_flags: <defaults>
</compile_context>

<pallas_src>
import functools
import math
import warnings

import jax
import jax.numpy as jnp
import numpy as np
from jax.experimental import pallas as pl
from jax.experimental.pallas import tpu as pltpu

_LANE = 128
_SUBLANE = 8
_MAX_TILE_ROWS = 1024          # 1024 x 128 x 4B = 512 KiB per f32 block (x2 double-buffered)


def _round_up(a, b):
    return -(-a // b) * b


def _prep_2d(x, pad_value):
    """Flatten x to (rows_pad, 128) in its native dtype.

    rows_pad is a multiple of 8 and of the chosen tile_rows.  Zero-copy (pure reshape) whenever
    the element count lines up; otherwise a single concatenate pads only the tail.
    Returns (x2d, n, tile_rows, grid_size).
    """
    flat = x.reshape(-1)
    n = flat.shape[0]
    rows = max(1, -(-n // _LANE))
    rows8 = _round_up(rows, _SUBLANE)
    if rows8 <= _MAX_TILE_ROWS:
        tile_rows = rows8
        rows_pad = rows8
    else:
        tile_rows = _MAX_TILE_ROWS
        rows_pad = _round_up(rows8, tile_rows)
    total = rows_pad * _LANE
    if total != n:
        fill = jnp.full((total - n,), pad_value, flat.dtype)
        flat = jnp.concatenate([flat, fill])
    return flat.reshape(rows_pad, _LANE), n, tile_rows, rows_pad // tile_rows


# ----------------------------------------------------------------------------
# Pallas kernel 1: aminmax reduction
# ----------------------------------------------------------------------------
def _aminmax_kernel(x_ref, min_ref, max_ref):
    i = pl.program_id(0)
    x = x_ref[...].astype(jnp.float32)                  # (tile_rows, 128)
    pmin = jnp.min(x, axis=0, keepdims=True)            # (1, 128)
    pmax = jnp.max(x, axis=0, keepdims=True)

    @pl.when(i == 0)
    def _():
        min_ref[...] = pmin
        max_ref[...] = pmax

    @pl.when(i > 0)
    def _():
        min_ref[...] = jnp.minimum(min_ref[...], pmin)
        max_ref[...] = jnp.maximum(max_ref[...], pmax)


@jax.jit
def _aminmax_impl(x):
    flat = x.reshape(-1)
    # pad (if needed at all) with a real data value -> neutral for both min and max
    x2d, _, tile_rows, grid = _prep_2d(x, flat[-1])
    pmin, pmax = pl.pallas_call(
        _aminmax_kernel,
        out_shape=(jax.ShapeDtypeStruct((1, _LANE), jnp.float32),
                   jax.ShapeDtypeStruct((1, _LANE), jnp.float32)),
        grid=(grid,),
        in_specs=[pl.BlockSpec((tile_rows, _LANE), lambda i: (i, 0))],
        out_specs=(pl.BlockSpec((1, _LANE), lambda i: (0, 0)),
                   pl.BlockSpec((1, _LANE), lambda i: (0, 0))),
        compiler_params=pltpu.CompilerParams(dimension_semantics=("arbitrary",)),
    )(x2d)
    # tiny finishing reduce (128 -> 1) in plain JAX glue
    return jnp.min(pmin), jnp.max(pmax)


def pallas_aminmax(x):
    x = jnp.asarray(x)
    if x.size == 0:
        raise ValueError("aminmax of empty tensor")
    return _aminmax_impl(x)


# ----------------------------------------------------------------------------
# Pallas kernel 2: histogram (torch.histc semantics: out-of-range dropped, x==max -> last bin)
# ----------------------------------------------------------------------------
def _hist_kernel(params_ref, x_ref, hist_ref, *, bins, tile_rows):
    i = pl.program_id(0)
    lo = params_ref[0]                                   # SMEM scalars -> no recompile per step
    hi = params_ref[1]
    n_tiles = bins // _LANE
    inv_width = bins / (hi - lo)

    @pl.when(i == 0)
    def _():
        hist_ref[...] = jnp.zeros_like(hist_ref)

    # iotas hoisted out of the chunk loop (JAX does not CSE broadcasts)
    s_iota = jax.lax.broadcasted_iota(jnp.int32, (_SUBLANE, _LANE, _LANE), 2)
    t_iota = jax.lax.broadcasted_iota(jnp.int32, (_SUBLANE, _LANE, n_tiles), 2)

    n_chunks = tile_rows // _SUBLANE

    def body(c, acc):
        start = pl.multiple_of(c * _SUBLANE, _SUBLANE)
        x = x_ref[pl.ds(start, _SUBLANE), :].astype(jnp.float32)        # (8, 128)
        in_range = (x >= lo) & (x <= hi)                                # NaN / OOR -> dropped
        idx = jnp.clip(jnp.floor((x - lo) * inv_width),
                       0.0, float(bins - 1)).astype(jnp.int32)          # [0, bins)
        s_idx = jnp.bitwise_and(idx, _LANE - 1)                         # bin % 128
        t_idx = jnp.right_shift(idx, 7)                                 # bin // 128
        t_idx = jnp.where(in_range, t_idx, -1)                          # never matches a tile

        # one-hots over elements, contracted on the MXU:
        #   a[e, s] = [s_idx(e) == s]   (1024, 128)
        #   b[e, t] = [t_idx(e) == t]   (1024, 16)
        #   part[t, s] = sum_e b[e, t] * a[e, s]
        a = (s_idx[:, :, None] == s_iota).astype(jnp.float32)
        b = (t_idx[:, :, None] == t_iota).astype(jnp.float32)
        a = a.reshape(_SUBLANE * _LANE, _LANE)
        b = b.reshape(_SUBLANE * _LANE, n_tiles)
        part = jax.lax.dot_general(b, a, (((0,), (0,)), ((), ())),
                                   preferred_element_type=jnp.float32)  # (16, 128)
        return acc + part

    acc = jax.lax.fori_loop(0, n_chunks, body, jnp.zeros((n_tiles, _LANE), jnp.float32))
    hist_ref[...] += acc                                  # one lane-dense bulk update per step


@functools.partial(jax.jit, static_argnames=("bins",))
def _histc_impl(x, lo, hi, *, bins):
    params = jnp.stack([jnp.asarray(lo, jnp.float32), jnp.asarray(hi, jnp.float32)])
    x2d, _, tile_rows, grid = _prep_2d(x, jnp.nan)        # NaN padding never lands in a bin
    n_tiles = bins // _LANE
    hist2d = pl.pallas_call(
        functools.partial(_hist_kernel, bins=bins, tile_rows=tile_rows),
        out_shape=jax.ShapeDtypeStruct((n_tiles, _LANE), jnp.float32),
        grid=(grid,),
        in_specs=[pl.BlockSpec(memory_space=pltpu.MemorySpace.SMEM),
                  pl.BlockSpec((tile_rows, _LANE), lambda i: (i, 0))],
        out_specs=pl.BlockSpec((n_tiles, _LANE), lambda i: (0, 0)),
        compiler_params=pltpu.CompilerParams(dimension_semantics=("arbitrary",)),
    )(params, x2d)
    # hist2d[t, s] counts bin t*128 + s  ->  1-D histogram
    return hist2d.reshape(-1)


def pallas_histc(x, bins, lo, hi):
    assert bins % _LANE == 0, bins
    return _histc_impl(jnp.asarray(x), float(lo), float(hi), bins=bins)


# ----------------------------------------------------------------------------
# Pallas kernel 3: min/max fake-quantization (elementwise hot path)
# ----------------------------------------------------------------------------
def _quant_kernel(params_ref, x_ref, o_ref, *, bits):
    x = x_ref[...].astype(jnp.float32)
    if bits == 1:
        o_ref[...] = (jnp.sign(x) - 1.0).astype(o_ref.dtype)
    else:
        lo = params_ref[0]
        hi = params_ref[1]
        n = float(2.0 ** bits - 1.0)
        inv_range = 1.0 / (hi - lo)                       # scalar, once per grid step
        step = (hi - lo) * (1.0 / n)
        q = jnp.floor((x - lo) * (inv_range * n) + 0.5)
        o_ref[...] = (q * step + lo).astype(o_ref.dtype)


@functools.partial(jax.jit, static_argnames=("bits",))
def _quant_impl(x, lo, hi, *, bits):
    params = jnp.stack([jnp.asarray(lo, jnp.float32), jnp.asarray(hi, jnp.float32)])
    shape, dtype = x.shape, x.dtype
    x2d, n, tile_rows, grid = _prep_2d(x, 0)
    out2d = pl.pallas_call(
        functools.partial(_quant_kernel, bits=int(bits)),
        out_shape=jax.ShapeDtypeStruct(x2d.shape, dtype),
        grid=(grid,),
        in_specs=[pl.BlockSpec(memory_space=pltpu.MemorySpace.SMEM),
                  pl.BlockSpec((tile_rows, _LANE), lambda i: (i, 0))],
        out_specs=pl.BlockSpec((tile_rows, _LANE), lambda i: (i, 0)),
        compiler_params=pltpu.CompilerParams(dimension_semantics=("parallel",)),
    )(params, x2d)
    if x2d.shape[0] * _LANE == n:
        return out2d.reshape(shape)                       # zero-copy fast path
    return out2d.reshape(-1)[:n].reshape(shape)


def min_max_quantize(x, bits, min_val=None, max_val=None):
    """Pallas port of the reference min_max_quantize."""
    assert bits >= 1, bits
    x = jnp.asarray(x)
    if x.size == 0:
        return x
    if bits == 1:
        return _quant_impl(x, 0.0, 1.0, bits=1)
    if min_val is None or max_val is None:
        mn, mx = pallas_aminmax(x)
        min_val, max_val = float(mn), float(mx)
    return _quant_impl(x, float(min_val), float(max_val), bits=int(bits))


# ----------------------------------------------------------------------------
# HistogramQuant module (host-side observer state, Pallas kernels for the tensor compute)
# ----------------------------------------------------------------------------
class HistogramQuant:

    def __init__(self, name, bits, counter, **kwargs):
        self.name = name
        self.bits = bits
        self.quant_func = min_max_quantize
        self._counter = counter
        self.min_val = None
        self.max_val = None
        self.bins = 2048
        self.upsample_rate = 128
        self.histogram = np.zeros(self.bins, dtype=np.float32)
        self.dst_nbins = 2 ** self.bits
        self.calculated = False

    @property
    def counter(self):
        return self._counter

    # ----- host-side observer bookkeeping (NumPy / Python scalars) -----
    def _adjust_min_max(self, combined_min, combined_max, upsample_rate):
        hist_bin_width = (self.max_val - self.min_val) / (self.bins * upsample_rate)
        downsample_rate = int(math.ceil((combined_max - combined_min) / (self.bins * hist_bin_width)))
        e = downsample_rate * (self.bins * hist_bin_width) - (combined_max - combined_min)
        combined_max = combined_max + e
        start_idx = int(round((self.min_val - combined_min) / hist_bin_width))
        return combined_min, combined_max, downsample_rate, start_idx

    def _get_norm(self, delta_begin, delta_end, density):
        norm = (delta_end * delta_end * delta_end - delta_begin * delta_begin * delta_begin) / 3
        return density * norm

    def _compute_quantization_error(self, next_start_bin, next_end_bin):
        bin_width = (self.max_val - self.min_val) / self.bins
        dst_bin_width = bin_width * (next_end_bin - next_start_bin + 1) / self.dst_nbins
        if dst_bin_width == 0.0:
            return 0.0
        src_bin = np.arange(self.bins)
        src_bin_begin = (src_bin - next_start_bin) * bin_width
        src_bin_end = src_bin_begin + bin_width
        dst_bin_of_begin = np.clip(np.floor(src_bin_begin / dst_bin_width), 0, self.dst_nbins - 1)
        dst_bin_of_begin_center = (dst_bin_of_begin + 0.5) * dst_bin_width
        dst_bin_of_end = np.clip(np.floor(src_bin_end / dst_bin_width), 0, self.dst_nbins - 1)
        density = self.histogram / bin_width
        norm = np.zeros(self.bins)
        delta_begin = src_bin_begin - dst_bin_of_begin_center
        delta_end = dst_bin_width / 2
        norm += self._get_norm(delta_begin, np.ones(self.bins) * delta_end, density)
        norm += (dst_bin_of_end - dst_bin_of_begin - 1) * self._get_norm(
            -dst_bin_width / 2, dst_bin_width / 2, density)
        dst_bin_of_end_center = dst_bin_of_end * dst_bin_width + dst_bin_width / 2
        delta_begin = -dst_bin_width / 2
        delta_end = src_bin_end - dst_bin_of_end_center
        norm += self._get_norm(delta_begin, delta_end, density)
        return float(norm.sum())

    def _combine_histograms(self, orig_hist, new_hist, upsample_rate, downsample_rate,
                            start_idx, Nbins):
        upsampled_histogram = np.repeat(np.asarray(new_hist, np.float64), upsample_rate)
        histogram_with_output_range = np.zeros(Nbins * downsample_rate, dtype=np.float64)
        histogram_with_output_range[start_idx:Nbins * upsample_rate + start_idx] = upsampled_histogram
        integral_histogram = np.cumsum(histogram_with_output_range,
                                       dtype=np.float64)[downsample_rate - 1::downsample_rate]
        shifted_integral_histogram = np.zeros(Nbins, dtype=np.float64)
        shifted_integral_histogram[1:Nbins] = integral_histogram[0:-1]
        interpolated_histogram = (integral_histogram - shifted_integral_histogram) / upsample_rate
        return np.asarray(orig_hist, np.float32) + interpolated_histogram.astype(np.float32)

    def _non_linear_param_search(self):
        # TODO(synk): data-dependent scalar while-loop search has no clean Pallas equivalent;
        # it runs host-side (np.searchsorted replaces the reference's linear cSum scans).
        assert self.histogram.shape[0] == self.bins, 'bins mistmatch'
        bin_width = (self.max_val - self.min_val) / self.bins
        total = float(self.histogram.sum())
        cSum = np.cumsum(self.histogram)
        stepsize = 1e-05
        alpha, beta = 0.0, 1.0
        start_bin, end_bin = 0, self.bins - 1
        norm_min = float('inf')
        while alpha < beta:
            next_alpha = alpha + stepsize
            next_beta = beta - stepsize
            l = int(min(end_bin, max(start_bin,
                                     np.searchsorted(cSum, next_alpha * total, side='left'))))
            r = int(max(start_bin, min(end_bin,
                                       np.searchsorted(cSum, next_beta * total, side='right') - 1)))
            next_start_bin, next_end_bin = start_bin, end_bin
            if l - start_bin > end_bin - r:
                next_start_bin = l
                alpha = next_alpha
            else:
                next_end_bin = r
                beta = next_beta
            if next_start_bin == start_bin and next_end_bin == end_bin:
                continue
            norm = self._compute_quantization_error(next_start_bin, next_end_bin)
            if norm > norm_min:
                break
            norm_min = norm
            start_bin, end_bin = next_start_bin, next_end_bin
        new_min = self.min_val + bin_width * start_bin
        new_max = self.min_val + bin_width * (end_bin + 1)
        return new_min, new_max

    def _calculate_qparams(self):
        if self.min_val is None and self.max_val is None:
            warnings.warn('must run observer before calling calculate_qparams. '
                          'Returning default scale and zero point')
            return np.array([1.0]), np.array([0])
        assert self.bins == len(self.histogram)
        new_min, new_max = self._non_linear_param_search()
        self.min_val = float(new_min)
        self.max_val = float(new_max)
        self.calculated = True

    # ----- forward -----
    def forward(self, x_orig):
        if self._counter > 0:
            self._counter -= int(x_orig.shape[0])
            is_uninitialized = self.min_val is None and self.max_val is None
            if x_orig.size == 0:
                return x_orig
            x = x_orig
            mn, mx = pallas_aminmax(x)                            # Pallas reduction
            min_val_cur, max_val_cur = float(mn), float(mx)
            if is_uninitialized or float(self.min_val) == float(self.max_val):
                self.min_val = float(np.float32(min_val_cur))
                self.max_val = float(np.float32(max_val_cur))
            else:
                combined_min = min(min_val_cur, self.min_val)
                combined_max = max(max_val_cur, self.max_val)
                combined_min, combined_max, downsample_rate, start_idx = \
                    self._adjust_min_max(combined_min, combined_max, self.upsample_rate)
                # NOTE: int() truncation of the range matches the PyTorch reference's
                #       torch.histc(x, bins, min=int(combined_min), max=int(combined_max))
                combined_histogram = np.asarray(
                    pallas_histc(x, self.bins,
                                 lo=float(int(combined_min)),
                                 hi=float(int(combined_max))),                # Pallas histogram
                    dtype=np.float32)
                if combined_min == self.min_val and combined_max == self.max_val:
                    combined_histogram = combined_histogram + self.histogram
                else:
                    combined_histogram = self._combine_histograms(
                        combined_histogram, self.histogram, self.upsample_rate,
                        downsample_rate, start_idx, self.bins)
                self.histogram = np.asarray(combined_histogram, np.float32)
                self.min_val = float(combined_min)
                self.max_val = float(combined_max)
            return x_orig
        else:
            if self.calculated is False:
                self._calculate_qparams()
            return self.quant_func(x_orig, self.bits, self.min_val, self.max_val)   # Pallas quant

    def __repr__(self):
        return '{}(bits={} min_val={} max_val={} calculated={})'.format(
            self.__class__.__name__, self.bits, self.min_val, self.max_val, self.calculated)


# ----------------------------------------------------------------------------
# demo / self-check
# ----------------------------------------------------------------------------
if __name__ == "__main__":
    key = jax.random.PRNGKey(0)
    k1, k2, k3 = jax.random.split(key, 3)
    shape = (2, 4, 16, 16)                                  # NCHW
    x1 = 2.0 * jax.random.normal(k1, shape, jnp.float32)
    x2 = 2.5 * jax.random.normal(k2, shape, jnp.float32) + 0.3
    x3 = jax.random.normal(k3, shape, jnp.float32)

    obs = HistogramQuant("act_quant", bits=8, counter=4)

    y1 = obs.forward(x1)    # observer step 1: Pallas aminmax sets min/max, passes input through
    y2 = obs.forward(x2)    # observer step 2: Pallas histc + host-side histogram combination
    y3 = obs.forward(x3)    # counter exhausted: param search then Pallas fake-quantize
    jax.block_until_ready(y3)

    # --- sanity checks ---
    assert y1.shape == shape and y2.shape == shape and y3.shape == shape
    np.testing.assert_allclose(np.asarray(y1), np.asarray(x1))          # observer is identity
    np.testing.assert_allclose(np.asarray(y2), np.asarray(x2))

    # aminmax kernel vs plain JAX
    mn, mx = pallas_aminmax(x1)
    np.testing.assert_allclose(float(mn), float(jnp.min(x1)), rtol=1e-6, atol=1e-6)
    np.testing.assert_allclose(float(mx), float(jnp.max(x1)), rtol=1e-6, atol=1e-6)

    # histogram kernel total count vs numpy reference
    h_pl = np.asarray(pallas_histc(x1, 2048, -3.0, 3.0))
    xv = np.asarray(x1).ravel()
    n_in_range = int(((xv >= -3.0) & (xv <= 3.0)).sum())
    assert abs(float(h_pl.sum()) - n_in_range) < 1e-3
    h_np, _ = np.histogram(xv[(xv >= -3.0) & (xv <= 3.0)], bins=2048, range=(-3.0, 3.0))
    assert abs(float(h_pl.sum()) - float(h_np.sum())) < 1e-3

    # quantizer output within one quantization step of a plain-JAX reference
    assert obs.calculated
    lo, hi = obs.min_val, obs.max_val
    nlevels = 2.0 ** obs.bits - 1.0
    ref = jnp.floor((x3 - lo) / (hi - lo) * nlevels + 0.5) * (hi - lo) / nlevels + lo
    step = (hi - lo) / nlevels
    assert float(jnp.max(jnp.abs(y3 - ref))) <= step + 1e-5
    assert float(obs.histogram.sum()) > 0.0

    print("KERNEL_OK")
</pallas_src>

<mosaic_0001>
module attributes {stable_mosaic.version = 11 : i64} {
  func.func @_aminmax_kernel(%arg0: i32, %arg1: memref<16x128xf32, #tpu.memory_space<vmem>>, %arg2: memref<1x128xf32, #tpu.memory_space<vmem>>, %arg3: memref<1x128xf32, #tpu.memory_space<vmem>>) attributes {dimension_semantics = [#tpu.dimension_semantics<arbitrary>], iteration_bounds = array<i64: 1>, scalar_prefetch = 0 : i64, scratch_operands = 0 : i64, tpu.core_type = #tpu.core_type<tc>, window_params = [{transform_indices = @transform_0, window_bounds = array<i64: 16, 128>}, {pipeline_mode = #tpu.pipeline_mode<synchronous>, transform_indices = @transform_1, window_bounds = array<i64: 1, 128>}, {pipeline_mode = #tpu.pipeline_mode<synchronous>, transform_indices = @transform_2, window_bounds = array<i64: 1, 128>}]} {
    %c0 = arith.constant 0 : index
    %c0_0 = arith.constant 0 : index
    %0 = vector.load %arg1[%c0, %c0_0] : memref<16x128xf32, #tpu.memory_space<vmem>>, vector<16x128xf32>
    %cst = arith.constant dense<0x7F800000> : vector<128xf32>
    %1 = vector.multi_reduction <minimumf>, %0, %cst [0] : vector<16x128xf32> to vector<128xf32>
    %2 = vector.shape_cast %1 : vector<128xf32> to vector<1x128xf32>
    %cst_1 = arith.constant dense<0xFF800000> : vector<128xf32>
    %3 = vector.multi_reduction <maximumf>, %0, %cst_1 [0] : vector<16x128xf32> to vector<128xf32>
    %4 = vector.shape_cast %3 : vector<128xf32> to vector<1x128xf32>
    %c0_i32 = arith.constant 0 : i32
    %5 = arith.cmpi eq, %arg0, %c0_i32 : i32
    %6 = arith.extui %5 : i1 to i32
    %c0_i32_2 = arith.constant 0 : i32
    %7 = arith.cmpi ne, %6, %c0_i32_2 : i32
    scf.if %7 {
      %c0_5 = arith.constant 0 : index
      %c0_6 = arith.constant 0 : index
      %11 = vector.load %arg2[%c0_5, %c0_6] : memref<1x128xf32, #tpu.memory_space<vmem>>, vector<1x128xf32>
      tpu.vector_store %arg2[%c0_5, %c0_6], %2 {strides = array<i32>} : memref<1x128xf32, #tpu.memory_space<vmem>>, vector<1x128xf32>,
      %c0_7 = arith.constant 0 : index
      %c0_8 = arith.constant 0 : index
      %12 = vector.load %arg3[%c0_7, %c0_8] : memref<1x128xf32, #tpu.memory_space<vmem>>, vector<1x128xf32>
      tpu.vector_store %arg3[%c0_7, %c0_8], %4 {strides = array<i32>} : memref<1x128xf32, #tpu.memory_space<vmem>>, vector<1x128xf32>,
    } else {
    }
    %c0_i32_3 = arith.constant 0 : i32
    %8 = arith.cmpi sgt, %arg0, %c0_i32_3 : i32
    %9 = arith.extui %8 : i1 to i32
    %c0_i32_4 = arith.constant 0 : i32
    %10 = arith.cmpi ne, %9, %c0_i32_4 : i32
    scf.if %10 {
      %c0_5 = arith.constant 0 : index
      %c0_6 = arith.constant 0 : index
      %11 = vector.load %arg2[%c0_5, %c0_6] : memref<1x128xf32, #tpu.memory_space<vmem>>, vector<1x128xf32>
      %12 = arith.minimumf %11, %2 : vector<1x128xf32>
      %c0_7 = arith.constant 0 : index
      %c0_8 = arith.constant 0 : index
      %13 = vector.load %arg2[%c0_7, %c0_8] : memref<1x128xf32, #tpu.memory_space<vmem>>, vector<1x128xf32>
      tpu.vector_store %arg2[%c0_7, %c0_8], %12 {strides = array<i32>} : memref<1x128xf32, #tpu.memory_space<vmem>>, vector<1x128xf32>,
      %c0_9 = arith.constant 0 : index
      %c0_10 = arith.constant 0 : index
      %14 = vector.load %arg3[%c0_9, %c0_10] : memref<1x128xf32, #tpu.memory_space<vmem>>, vector<1x128xf32>
      %15 = arith.maximumf %14, %4 : vector<1x128xf32>
      %c0_11 = arith.constant 0 : index
      %c0_12 = arith.constant 0 : index
      %16 = vector.load %arg3[%c0_11, %c0_12] : memref<1x128xf32, #tpu.memory_space<vmem>>, vector<1x128xf32>
      tpu.vector_store %arg3[%c0_11, %c0_12], %15 {strides = array<i32>} : memref<1x128xf32, #tpu.memory_space<vmem>>, vector<1x128xf32>,
    } else {
    }
    return
  }
  func.func @transform_0(%arg0: i32) -> (i32, i32) {
    %c0_i32 = arith.constant 0 : i32
    %c0_i32_0 = arith.constant 0 : i32
    return %arg0, %c0_i32 : i32, i32
  }
  func.func @transform_1(%arg0: i32) -> (i32, i32) {
    %c0_i32 = arith.constant 0 : i32
    %c0_i32_0 = arith.constant 0 : i32
    %c0_i32_1 = arith.constant 0 : i32
    return %c0_i32, %c0_i32_0 : i32, i32
  }
  func.func @transform_2(%arg0: i32) -> (i32, i32) {
    %c0_i32 = arith.constant 0 : i32
    %c0_i32_0 = arith.constant 0 : i32
    %c0_i32_1 = arith.constant 0 : i32
    return %c0_i32, %c0_i32_0 : i32, i32
  }
}

</mosaic_0001>

<bundles_post_ra>
// kernel: _aminmax_impl.1
= control target key start
LH: loop header
LB: loop body
LE: loop exit
PB: predicated region body
PF: predicated region fallthrough
CT: control target
= control target key end

     0   :  { %s77_s0 = inlined_call_operand.vmem [shape: f32[16,128], index: 0, kind: input, shape index: {}]   ;;  %s78_s1 = inlined_call_operand.vmem [shape: f32[1,128], index: 1, kind: output, shape index: {0}]   ;;  %s79_s2 = inlined_call_operand.vmem [shape: f32[1,128], index: 2, kind: output, shape index: {1}]  }
   0x1   :  { %v10_v0 = vld [vmem:[%s77_s0] sm:$0xff]  ;;  %v11_v1 = vld [vmem:[%s77_s0 + $0x8] sm:$0xff] }
   0x2   :  { %v12_v2 = vmin.f32 %v10_v0, %v11_v1  ;;  %v19_v3 = vmax.f32 %v10_v0, %v11_v1 }
   0x4   :  { %v13_v4 = vrot.slane %v12_v2, 4  ;;  %v20_v5 = vrot.slane %v19_v3, 4 }
   0x6   :  { %v14_v6 = vmin.f32 %v12_v2, %v13_v4  ;;  %v21_v7 = vmax.f32 %v19_v3, %v20_v5 }
   0x8   :  { %v15_v8 = vrot.slane %v14_v6, 2  ;;  %v22_v9 = vrot.slane %v21_v7, 2 }
   0xa   :  { %v16_v10 = vmin.f32 %v14_v6, %v15_v8  ;;  %v23_v11 = vmax.f32 %v21_v7, %v22_v9 }
   0xc   :  { %v17_v12 = vrot.slane %v16_v10, 1  ;;  %v24_v13 = vrot.slane %v23_v11, 1 }
   0xe   :  { %v18_v14 = vmin.f32 %v16_v10, %v17_v12  ;;  %v25_v15 = vmax.f32 %v23_v11, %v24_v13 }
  0x10   :  { %30 = vst [vmem:[%s78_s1] sm:$0x1] %v18_v14  ;;  %31 = vst [vmem:[%s79_s2] sm:$0x1] %v25_v15 }

</bundles_post_ra>
